<compile_context>
chip_gen: v7x
topology: tpu7x:2x2x1
jax: 0.10.0
libtpu: 0.0.40
codegen_flags: <defaults>
</compile_context>

<pallas_src>
import jax
import jax.numpy as jnp
from jax.experimental import pallas as pl
from jax.experimental.pallas import tpu as pltpu

D_IN, D_HID, D_OUT = 42, 64, 7


def mlp_kernel(x_ref, w1_ref, b1_ref, w2_ref, b2_ref, o_ref):
    # x is consumed in its stored dtype (f32 or bf16); both dots accumulate in
    # f32 via preferred_element_type, matching the `.float()` forward pass.
    x = x_ref[...]
    h = jnp.dot(x, w1_ref[...], preferred_element_type=jnp.float32) + b1_ref[...]
    h = jnp.maximum(h, 0.0)  # ReLU on the VPU, fused with the MXU results
    o_ref[...] = (
        jnp.dot(h, w2_ref[...], preferred_element_type=jnp.float32) + b2_ref[...]
    )


def _round_up(n, m):
    return ((n + m - 1) // m) * m


def _cdiv(a, b):
    return (a + b - 1) // b


def _choose_tile(batch, tile_m):
    """Pick a batch tile: big enough to hide per-step overhead, >=2 steps when
    the batch is big enough to care, always a multiple of 8 (sublane rule)."""
    batch8 = _round_up(max(batch, 1), 8)
    if batch8 <= tile_m:
        if batch8 <= 1024:
            # Tiny batch: one step; splitting would only add step overhead.
            return batch8
        # Medium batch: split into 2 steps for pipeline overlap / v7x 2-TC.
        return _round_up(_cdiv(batch8, 2), 8)
    # Large batch: full-size tiles, grid automatically has >= 2 steps.
    return tile_m


def resnet_forward(x, w1, b1, w2, b2, *, tile_m=8192):
    batch = x.shape[0]
    if batch == 0:
        return jnp.zeros((0, D_OUT), jnp.float32)

    # Match the module's `.float()` for non-float inputs; keep f32/bf16 as-is
    # (bf16 halves the dominant HBM read and the MXU takes it natively).
    if not jnp.issubdtype(x.dtype, jnp.floating):
        x = x.astype(jnp.float32)

    tile = _choose_tile(batch, tile_m)
    grid = (_cdiv(batch, tile),)  # ragged trailing block handled by Pallas masking

    itemsize = jnp.dtype(x.dtype).itemsize
    weight_bytes = 4 * (D_IN * D_HID + D_HID + D_HID * D_OUT + D_OUT)
    cost = pl.CostEstimate(
        flops=2 * batch * (D_IN * D_HID + D_HID * D_OUT),
        bytes_accessed=batch * D_IN * itemsize + batch * D_OUT * 4 + weight_bytes,
        transcendentals=0,
    )

    return pl.pallas_call(
        mlp_kernel,
        out_shape=jax.ShapeDtypeStruct((batch, D_OUT), jnp.float32),
        grid=grid,
        in_specs=[
            # Activations stream through VMEM, one batch tile per grid step.
            pl.BlockSpec((tile, D_IN), lambda i: (i, 0)),
            # Weights/biases: constant index_map -> fetched once, VMEM-resident.
            pl.BlockSpec((D_IN, D_HID), lambda i: (0, 0)),
            pl.BlockSpec((1, D_HID), lambda i: (0, 0)),
            pl.BlockSpec((D_HID, D_OUT), lambda i: (0, 0)),
            pl.BlockSpec((1, D_OUT), lambda i: (0, 0)),
        ],
        out_specs=pl.BlockSpec((tile, D_OUT), lambda i: (i, 0)),
        compiler_params=pltpu.CompilerParams(
            # Independent batch tiles; lets v7x shard steps across its 2 TCs.
            # (If profiling shows one idle TC there, switch to CORE_PARALLEL.)
            dimension_semantics=("parallel",),
        ),
        cost_estimate=cost,
    )(x, w1, b1, w2, b2)


def init_params(key):
    """Deterministic init mirroring nn.Linear default (uniform +/- 1/sqrt(fan_in))."""
    k1, k2, k3, k4 = jax.random.split(key, 4)
    bound1 = 1.0 / jnp.sqrt(float(D_IN))
    bound2 = 1.0 / jnp.sqrt(float(D_HID))
    w1 = jax.random.uniform(k1, (D_IN, D_HID), jnp.float32, -bound1, bound1)
    b1 = jax.random.uniform(k2, (1, D_HID), jnp.float32, -bound1, bound1)
    w2 = jax.random.uniform(k3, (D_HID, D_OUT), jnp.float32, -bound2, bound2)
    b2 = jax.random.uniform(k4, (1, D_OUT), jnp.float32, -bound2, bound2)
    return w1, b1, w2, b2


def _ref_forward(x, w1, b1, w2, b2):
    xf = x.astype(jnp.float32)
    return jnp.maximum(xf @ w1 + b1, 0.0) @ w2 + b2


if __name__ == "__main__":
    key = jax.random.PRNGKey(0)
    kx, kp = jax.random.split(key)
    w1, b1, w2, b2 = init_params(kp)

    # Small batch, exact f32 check.
    batch = 8
    x = jax.random.normal(kx, (batch, D_IN), jnp.float32)
    out = jax.block_until_ready(resnet_forward(x, w1, b1, w2, b2))
    ref = _ref_forward(x, w1, b1, w2, b2)
    assert out.shape == (batch, D_OUT)
    assert jnp.allclose(out, ref, atol=1e-5, rtol=1e-5)

    # Non-multiple-of-8 batch: exercises the masked partial block (no padding copy).
    x5 = jax.random.normal(kx, (5, D_IN), jnp.float32)
    out5 = jax.block_until_ready(resnet_forward(x5, w1, b1, w2, b2))
    assert out5.shape == (5, D_OUT)
    assert jnp.allclose(out5, _ref_forward(x5, w1, b1, w2, b2), atol=1e-5, rtol=1e-5)

    # Medium ragged batch: 2 grid steps with a ragged trailing tile.
    big_batch = 3000
    xb = jax.random.normal(kx, (big_batch, D_IN), jnp.float32)
    out_b = jax.block_until_ready(resnet_forward(xb, w1, b1, w2, b2))
    assert out_b.shape == (big_batch, D_OUT)
    assert jnp.allclose(out_b, _ref_forward(xb, w1, b1, w2, b2), atol=1e-5, rtol=1e-5)

    # bf16 activation path (halved HBM read); looser tolerance vs f32 reference.
    out_bf16 = jax.block_until_ready(resnet_forward(x.astype(jnp.bfloat16), w1, b1, w2, b2))
    assert jnp.allclose(out_bf16, ref, atol=1e-1, rtol=1e-1)

    print("KERNEL_OK")
</pallas_src>

<mosaic_0001>
module attributes {stable_mosaic.version = 11 : i64} {
  func.func @mlp_kernel(%arg0: i32, %arg1: memref<8x42xf32, #tpu.memory_space<vmem>>, %arg2: memref<42x64xf32, #tpu.memory_space<vmem>>, %arg3: memref<1x64xf32, #tpu.memory_space<vmem>>, %arg4: memref<64x7xf32, #tpu.memory_space<vmem>>, %arg5: memref<1x7xf32, #tpu.memory_space<vmem>>, %arg6: memref<8x7xf32, #tpu.memory_space<vmem>>) attributes {dimension_semantics = [#tpu.dimension_semantics<parallel>], iteration_bounds = array<i64: 1>, scalar_prefetch = 0 : i64, scratch_operands = 0 : i64, tpu.core_type = #tpu.core_type<tc>, window_params = [{transform_indices = @transform_0, window_bounds = array<i64: 8, 42>}, {pipeline_mode = #tpu.pipeline_mode<synchronous>, transform_indices = @transform_1, window_bounds = array<i64: 42, 64>}, {pipeline_mode = #tpu.pipeline_mode<synchronous>, transform_indices = @transform_2, window_bounds = array<i64: 1, 64>}, {pipeline_mode = #tpu.pipeline_mode<synchronous>, transform_indices = @transform_3, window_bounds = array<i64: 64, 7>}, {pipeline_mode = #tpu.pipeline_mode<synchronous>, transform_indices = @transform_4, window_bounds = array<i64: 1, 7>}, {transform_indices = @transform_5, window_bounds = array<i64: 8, 7>}]} {
    %c0 = arith.constant 0 : index
    %c0_0 = arith.constant 0 : index
    %0 = vector.load %arg1[%c0, %c0_0] : memref<8x42xf32, #tpu.memory_space<vmem>>, vector<8x42xf32>
    %c0_1 = arith.constant 0 : index
    %c0_2 = arith.constant 0 : index
    %1 = vector.load %arg2[%c0_1, %c0_2] : memref<42x64xf32, #tpu.memory_space<vmem>>, vector<42x64xf32>
    %cst = arith.constant dense<0.000000e+00> : vector<8x64xf32>
    %2 = tpu.matmul %0, %1, %cst {dimension_numbers = #tpu.dot_dimension_numbers<[1], [0], [0], [1], [0, 0, 1, 1], [], []>} : vector<8x42xf32>, vector<42x64xf32>, vector<8x64xf32> -> vector<8x64xf32>
    %c0_3 = arith.constant 0 : index
    %c0_4 = arith.constant 0 : index
    %3 = vector.load %arg3[%c0_3, %c0_4] : memref<1x64xf32, #tpu.memory_space<vmem>>, vector<1x64xf32>
    %4 = vector.broadcast %3 : vector<1x64xf32> to vector<8x64xf32>
    %5 = arith.addf %2, %4 : vector<8x64xf32>
    %cst_5 = arith.constant 0.000000e+00 : f32
    %6 = vector.broadcast %cst_5 : f32 to vector<8x64xf32>
    %7 = arith.maximumf %5, %6 : vector<8x64xf32>
    %c0_6 = arith.constant 0 : index
    %c0_7 = arith.constant 0 : index
    %8 = vector.load %arg4[%c0_6, %c0_7] : memref<64x7xf32, #tpu.memory_space<vmem>>, vector<64x7xf32>
    %cst_8 = arith.constant dense<0.000000e+00> : vector<8x7xf32>
    %9 = tpu.matmul %7, %8, %cst_8 {dimension_numbers = #tpu.dot_dimension_numbers<[1], [0], [0], [1], [0, 0, 1, 1], [], []>} : vector<8x64xf32>, vector<64x7xf32>, vector<8x7xf32> -> vector<8x7xf32>
    %c0_9 = arith.constant 0 : index
    %c0_10 = arith.constant 0 : index
    %10 = vector.load %arg5[%c0_9, %c0_10] : memref<1x7xf32, #tpu.memory_space<vmem>>, vector<1x7xf32>
    %11 = vector.broadcast %10 : vector<1x7xf32> to vector<8x7xf32>
    %12 = arith.addf %9, %11 : vector<8x7xf32>
    %c0_11 = arith.constant 0 : index
    %c0_12 = arith.constant 0 : index
    %13 = vector.load %arg6[%c0_11, %c0_12] : memref<8x7xf32, #tpu.memory_space<vmem>>, vector<8x7xf32>
    tpu.vector_store %arg6[%c0_11, %c0_12], %12 {strides = array<i32>} : memref<8x7xf32, #tpu.memory_space<vmem>>, vector<8x7xf32>,
    return
  }
  func.func @transform_0(%arg0: i32) -> (i32, i32) {
    %c0_i32 = arith.constant 0 : i32
    %c0_i32_0 = arith.constant 0 : i32
    return %arg0, %c0_i32 : i32, i32
  }
  func.func @transform_1(%arg0: i32) -> (i32, i32) {
    %c0_i32 = arith.constant 0 : i32
    %c0_i32_0 = arith.constant 0 : i32
    %c0_i32_1 = arith.constant 0 : i32
    return %c0_i32, %c0_i32_0 : i32, i32
  }
  func.func @transform_2(%arg0: i32) -> (i32, i32) {
    %c0_i32 = arith.constant 0 : i32
    %c0_i32_0 = arith.constant 0 : i32
    %c0_i32_1 = arith.constant 0 : i32
    return %c0_i32, %c0_i32_0 : i32, i32
  }
  func.func @transform_3(%arg0: i32) -> (i32, i32) {
    %c0_i32 = arith.constant 0 : i32
    %c0_i32_0 = arith.constant 0 : i32
    %c0_i32_1 = arith.constant 0 : i32
    return %c0_i32, %c0_i32_0 : i32, i32
  }
  func.func @transform_4(%arg0: i32) -> (i32, i32) {
    %c0_i32 = arith.constant 0 : i32
    %c0_i32_0 = arith.constant 0 : i32
    %c0_i32_1 = arith.constant 0 : i32
    return %c0_i32, %c0_i32_0 : i32, i32
  }
  func.func @transform_5(%arg0: i32) -> (i32, i32) {
    %c0_i32 = arith.constant 0 : i32
    %c0_i32_0 = arith.constant 0 : i32
    return %arg0, %c0_i32 : i32, i32
  }
}

</mosaic_0001>

<bundles_post_ra>
// kernel: tpu_custom_call.1
= control target key start
LH: loop header
LB: loop body
LE: loop exit
PB: predicated region body
PF: predicated region fallthrough
CT: control target
= control target key end

     0   :  { %v325_v3 = vmov 0.0|0.0   ;;  %vm326_vm0 = vmmov 0   ;;  %v327_v6 = vmov 0.0   ;;  %vm39_vm1 = vcmask 1041408   ;;  %s423_s0 = inlined_call_operand.vmem [shape: f32[8,42], index: 0, kind: input, shape index: {}]   ;;  %s424_s1 = inlined_call_operand.vmem [shape: f32[42,64], index: 1, kind: input, shape index: {}]   ;;  %s425_s2 = inlined_call_operand.vmem [shape: f32[1,64], index: 2, kind: input, shape index: {}]   ;;  %s426_s3 = inlined_call_operand.vmem [shape: f32[64,7], index: 3, kind: input, shape index: {}]   ;;  %s427_s4 = inlined_call_operand.vmem [shape: f32[1,7], index: 4, kind: input, shape index: {}]   ;;  %s428_s5 = inlined_call_operand.hbm [shape: f32[8,7], index: 5, kind: output, shape index: {}]  }
   0x1   :  { %v22_v0 = vld [vmem:[%s424_s1] sm:$0xff]  ;;  %v23_v1 = vld [vmem:[%s424_s1 + $0x8] sm:$0xff]  ;;  %v24_v2 = vld [vmem:[%s424_s1 + $0x10] sm:$0xff]  ;;  %274 = vmatprep.subr.bf16.mxu0 %v325_v3  ;;  %284 = vmatprep.subr.bf16.mxu1 %v325_v3 }
   0x2   :  { %v275_v4 = vpack.c.bf16 %v23_v1, %v22_v0  ;;  %v25_v5 = vld [vmem:[%s424_s1 + $0x18] sm:$0xff]  ;;  %252 = vmatprep.mubr.msk.f32.mxu0 %vm326_vm0, %v327_v6  ;;  %v114_v7 = vld [vmem:[%s426_s3] sm:$0xff]  ;;  %271 = vmatprep.mubr.msk.f32.mxu1 %vm326_vm0, %v327_v6  ;;  %v115_v9 = vld [vmem:[%s426_s3 + $0x8] sm:$0xff] }
   0x3   :  { %v278_v8 = vpack.c.bf16 %v25_v5, %v24_v2  ;;  %v116_v10 = vld [vmem:[%s426_s3 + $0x10] sm:$0xff]  ;;  %v117_v11 = vld [vmem:[%s426_s3 + $0x18] sm:$0xff]  ;;  %v26_v12 = vld [vmem:[%s424_s1 + $0x20] sm:$0xff]  ;;  %v285_v14 = vpack.c.bf16 %v115_v9, %v114_v7 }
   0x4   :  { %276 = vmatpush3.bf16.msra.mxu0 %v275_v4  ;;  %v27_v13 = vld [vmem:[%s424_s1 + $0x28] sm:$0x3] }
   0x5   :  { %277 = vmatprep.subr.bf16.mxu0 %v325_v3 }
   0x6   :  { %10 = vsyncpa [#allocation3], 0  ;;  %286 = vmatpush3.bf16.msra.mxu1 %v285_v14  ;;  %v288_v15 = vpack.c.bf16 %v117_v11, %v116_v10  ;;  %v281_v16 = vpack.c.bf16 %v27_v13, %v26_v12  ;;  %v118_v17 = vld [vmem:[%s426_s3 + $0x20] sm:$0xff]  ;;  %v119_v18 = vld [vmem:[%s426_s3 + $0x28] sm:$0xff]  ;;  %vm328_vm2 = vmmov 1   ;;  %vm35_vm4 = vcmask 343040  }
   0x7   :  { %287 = vmatprep.subr.bf16.mxu1 %v325_v3  ;;  %vm282_vm3 = vmpackc.low %vm39_vm1, %vm328_vm2  ;;  %v291_v19 = vpack.c.bf16 %v119_v18, %v118_v17  ;;  %v21_v20 = vld [vmem:[%s423_s0] sm:$0xff]  ;;  %v120_v21 = vld [vmem:[%s426_s3 + $0x30] sm:$0xff]  ;;  %vm129_vm5 = vcmask 523264   ;;  %s329_s25 = smov [#allocation2]   ;;  %vm203_vm6 = vcmask 56320  }
   0x8   :  { %279 = vmatpush3.bf16.msra.mxu0 %v278_v8  ;;  %v121_v22 = vld [vmem:[%s426_s3 + $0x38] sm:$0xff]  ;;  %v219_v24 = vld [vmem:[%s425_s2] ss:$0 sm:$0xff]  ;;  %s211_s26 = sshll.u32 %s329_s25, 4  ;;  %s212_s26 = int_to_ptr.vmem [resolvable:$true] %s211_s26 }
   0x9   :  { %280 = vmatprep.subr.bf16.mxu0 %v325_v3  ;;  %v294_v23 = vpack.c.bf16 %v121_v22, %v120_v21  ;;  %v222_v29 = vld [vmem:[%s427_s4] ss:$0 sm:$0xff]  ;;  %s301_s3 = scalar_lea.vmem %s212_s26, 128  ;;  %p306_p1 = scmp.lt.s32.totalorder %s212_s26, %s212_s26 }
   0xa   :  { %289 = vmatpush3.bf16.msra.mxu1 %v288_v15  ;;  %p302_p0 = scmp.ne.s32.totalorder %s212_s26, %s301_s3  ;;  %p307_p2 = scmp.lt.s32.totalorder %s301_s3, %s301_s3 }
   0xb   :  { %290 = vmatprep.subr.bf16.mxu1 %v325_v3 }
   0xc   :  { %283 = vmatpush3.bf16.msk.msra.mxu0 %vm282_vm3, %v281_v16  ;;  %p308_p3 = por %p307_p2, %p306_p1 }
   0xe   :  { %292 = vmatpush3.bf16.msra.mxu1 %v291_v19  ;;  %p309_p4 = pnand %p308_p3, %p302_p0 }
   0xf   :  { %253 = vmatmul.mubr.msk.f32.vlgmr.msra.gmra.mrb[0].mxu0 %vm35_vm4, %v21_v20  ;;  %293 = vmatprep.subr.bf16.mxu1 %v325_v3 }
  0x12   :  { %295 = vmatpush3.bf16.msra.mxu1 %v294_v23 }
  0xe2   :  { %v109_v25 = vpop.f32.mrb[0].mxu0 }
  0xe3   :  { %v110_v26 = vadd.f32 %v219_v24, %v109_v25  ;;  %v254_v27 = vpop.f32.mrb[1].mxu0 }
  0xe5   :  { %v113_v28 = vmax.f32 %v110_v26, 0.0 }
  0xe7   :  { %272 = vmatmul.mubr.msk.f32.vlgmr.msra.gmra.mrb[0].mxu1 %vm129_vm5, %v113_v28 }
 0x1ba   :  { %v199_v30 = vpop.f32.mrb[0].mxu1 }
 0x1bb   :  { %v200_v31 = vadd.f32 %v222_v29, %v199_v30  ;;  %v273_v32 = vpop.f32.mrb[1].mxu1 }
 0x1bd   :  { %204 = vst.msk [vmem:[#allocation2] sm:$0xff] %vm203_vm6, %v200_v31 }
 0x1be   :  { %312 = shalt.err (!%p309_p4)
}
 0x1bf   :  { %s313_s28 = scalar_lea.hbm %s428_s5, 128 }
 0x1c0   :  { %p314_p5 = scmp.ne.s32.totalorder %s428_s5, %s313_s28  ;;  %p317_p6 = scmp.lt.u32.totalorder %s313_s28, %s428_s5 }
 0x1c2   :  { %p319_p7 = pnand %p317_p6, %p314_p5 }
 0x1c4   :  { %322 = shalt.err (!%p319_p7)
}
 0x1c5   :  { %214 = dma.vmem_to_hbm [thread:$0]  %s212_s26, 128, %s428_s5, [#allocation3]  }
 0x1c6   :  { %323 = dma.done.wait [#allocation3], 128  }
 0x1c7   :  { %324 = vsyncadd [#allocation3], 4294967168 }
 0x1c8   :  { %218 = vsyncpa [#allocation3], 1 }

</bundles_post_ra>
